<compile_context>
chip_gen: v7x
topology: tpu7x:2x2x1
jax: 0.10.0
libtpu: 0.0.40
codegen_flags: <defaults>
</compile_context>

<pallas_src>
import functools
import itertools

import jax
import jax.numpy as jnp
import numpy as np
from jax.experimental import pallas as pl
from jax.experimental.pallas import tpu as pltpu

try:  # host-side assignment solver
    from scipy.optimize import linear_sum_assignment as _scipy_lsa
except Exception:  # pragma: no cover
    _scipy_lsa = None


# --------------------------------------------------------------------------
# Pallas kernel: one [T_pad, tn] tile of the transposed cost matrix C^T.
# Predictions arrive in natural [tn, C] layout (native dtype); targets are
# tiny resident operands.
#   tgt_small columns: 0-3 sub box, 4-7 obj box, 8 neg_rden*(Cv-sum_tv),
#                      9 neg_rden, 10 any(obj!=0), 11 all(obj==0), 12-15 pad
# --------------------------------------------------------------------------
def _cost_kernel(obj_logits_ref, verb_logits_ref, boxes_ref,
                 tgt_onehot_ref, verb_lhs_ref, tgt_small_ref,
                 c_ref, *, w_obj, w_verb, w_bbox, w_iou, ones_row):
    f32 = jnp.float32
    alpha = 0.25  # gamma = 2.0 -> explicit squares below

    # ---- focal object-class cost: gather raw logits with a one-hot matmul
    # on the MXU (contract the class dim of both operands so the prediction
    # axis stays on lanes), then apply the focal transform on the tiny
    # [T_pad, tn] tile (gather commutes exactly with the elementwise math).
    g = jax.lax.dot_general(
        tgt_onehot_ref[...], obj_logits_ref[...].astype(f32),
        dimension_numbers=(((1,), (1,)), ((), ())),
        preferred_element_type=f32)                               # [T_pad, tn]
    p = jax.nn.sigmoid(g)
    neg_cost = (1.0 - alpha) * (p * p) * (-jnp.log(1.0 - p + 1e-8))
    pos_cost = alpha * ((1.0 - p) * (1.0 - p)) * (-jnp.log(p + 1e-8))
    cost_obj_class = pos_cost - neg_cost                          # [T_pad, tn]

    ts = tgt_small_ref[...]                                       # [T_pad, 16]

    # ---- verb classification cost (single matmul via algebraic identity)
    #   (1-tv)@(1-vp)^T = Cv - sum_tv - sum_vp + tv@vp^T
    # The LHS rows are pre-scaled by (1/pos_den + 1/neg_den) in the wrapper
    # and row `ones_row` is all ones, so one matmul yields both the scaled
    # dot product and the per-prediction column sum sum_vp.
    verb_prob = jax.nn.sigmoid(verb_logits_ref[...].astype(f32))  # [tn, Cv]
    m = jax.lax.dot_general(
        verb_lhs_ref[...], verb_prob,
        dimension_numbers=(((1,), (1,)), ((), ())),
        preferred_element_type=f32)                               # [T_pad, tn]
    sum_vp = m[ones_row:ones_row + 1, :]                          # [1, tn]
    row_const = ts[:, 8:9]                                        # nr*(Cv-sum_tv)
    neg_rden = ts[:, 9:10]
    cost_verb_class = -0.5 * (m + row_const - neg_rden * sum_vp)  # [T_pad, tn]

    # ---- pairwise L1 box cost (cdist p=1), lane-dense per coordinate ----
    boxes = boxes_ref[...].astype(f32)                            # [8, tn]
    sub_b = boxes[0:4, :]
    obj_b = boxes[4:8, :]
    tsub = ts[:, 0:4]                                             # [T_pad, 4]
    tobj = ts[:, 4:8]
    obj_any = ts[:, 10:11]
    obj_allz = ts[:, 11:12]

    def l1_cdist(pred_t, tgt):
        c = jnp.abs(tgt[:, 0:1] - pred_t[0:1, :])
        for d in range(1, 4):
            c = c + jnp.abs(tgt[:, d:d + 1] - pred_t[d:d + 1, :])
        return c                                                  # [T_pad, tn]

    cost_sub_bbox = l1_cdist(sub_b, tsub)
    cost_obj_bbox = l1_cdist(obj_b, tobj) * obj_any
    cost_bbox = jnp.maximum(cost_sub_bbox, cost_obj_bbox)

    # ---- pairwise generalized IoU cost (cxcywh -> xyxy inline) ----
    def giou(pred_t, tgt):
        px0 = pred_t[0:1, :] - 0.5 * pred_t[2:3, :]
        py0 = pred_t[1:2, :] - 0.5 * pred_t[3:4, :]
        px1 = pred_t[0:1, :] + 0.5 * pred_t[2:3, :]
        py1 = pred_t[1:2, :] + 0.5 * pred_t[3:4, :]
        tx0 = tgt[:, 0:1] - 0.5 * tgt[:, 2:3]
        ty0 = tgt[:, 1:2] - 0.5 * tgt[:, 3:4]
        tx1 = tgt[:, 0:1] + 0.5 * tgt[:, 2:3]
        ty1 = tgt[:, 1:2] + 0.5 * tgt[:, 3:4]
        area_p = (px1 - px0) * (py1 - py0)                        # [1, tn]
        area_t = (tx1 - tx0) * (ty1 - ty0)                        # [T, 1]
        inter = (jnp.maximum(jnp.minimum(px1, tx1) - jnp.maximum(px0, tx0), 0.)
                 * jnp.maximum(jnp.minimum(py1, ty1) - jnp.maximum(py0, ty0),
                               0.))
        union = area_p + area_t - inter
        enc = (jnp.maximum(jnp.maximum(px1, tx1) - jnp.minimum(px0, tx0), 0.)
               * jnp.maximum(jnp.maximum(py1, ty1) - jnp.minimum(py0, ty0),
                             0.))
        # guard only the fully-degenerate (padding/garbage) pairs against 0/0
        safe_u = jnp.where(union == 0.0, 1.0, union)
        safe_e = jnp.where(enc == 0.0, 1.0, enc)
        return inter / safe_u - (enc - union) / safe_e

    cost_sub_iou = -giou(sub_b, tsub)
    cost_obj_iou = -giou(obj_b, tobj) + cost_sub_iou * obj_allz
    cost_iou = jnp.maximum(cost_sub_iou, cost_obj_iou)

    c_ref[...] = (w_obj * cost_obj_class + w_verb * cost_verb_class
                  + w_bbox * cost_bbox + w_iou * cost_iou).astype(c_ref.dtype)


# --------------------------------------------------------------------------
# Wrapper: layout plumbing + pallas_call with a 1-D grid over N (all jitted).
# --------------------------------------------------------------------------
def _round_up(x, m):
    return ((x + m - 1) // m) * m


def _cdiv(a, b):
    return (a + b - 1) // b


@functools.partial(jax.jit, static_argnames=("w_obj", "w_verb", "w_bbox",
                                             "w_iou", "tile_n"))
def pallas_cost_matrix(obj_logits, verb_logits, sub_boxes, obj_boxes,
                       tgt_obj_labels, tgt_verb_labels, tgt_sub_boxes,
                       tgt_obj_boxes, *, w_obj=1.0, w_verb=1.0, w_bbox=1.0,
                       w_iou=1.0, tile_n=2048):
    f32 = jnp.float32
    n, num_obj_classes = obj_logits.shape
    num_verb_classes = verb_logits.shape[1]
    t = int(tgt_obj_labels.shape[0])

    # ---- tile sizing: big tiles (v5e/v6e step-overhead amortization) but
    # >= 2 grid steps whenever possible (both v7x TensorCores busy, DMA/
    # compute overlap).  The last tile may be ragged; out-of-bounds lanes
    # only produce garbage in columns that are stripped after the kernel.
    num_tiles = max(2, _cdiv(n, tile_n))
    tn = min(_round_up(_cdiv(n, num_tiles), 128), _round_up(n, 128))
    grid = _cdiv(n, tn)

    t_pad = max(8, _round_up(t + 1, 8))   # always >= 1 spare row for ones-row
    ones_row = t

    def pad_t(x):
        return jnp.pad(x, ((0, t_pad - x.shape[0]), (0, 0)))

    # ---- tiny target-side operands (all precomputed / hoisted) ----
    tgt_onehot = pad_t(jax.nn.one_hot(tgt_obj_labels, num_obj_classes,
                                      dtype=f32))                  # [T_pad, Co]
    tv = tgt_verb_labels.astype(f32)                               # [T, Cv]
    sum_tv = jnp.sum(tv, axis=1, keepdims=True)
    pos_rden = 1.0 / (sum_tv + 1e-4)
    neg_rden = 1.0 / (float(num_verb_classes) - sum_tv + 1e-4)
    verb_lhs = pad_t(tv * (pos_rden + neg_rden))                   # [T_pad, Cv]
    verb_lhs = verb_lhs.at[ones_row, :].set(1.0)  # ones row -> column sums
    row_const = neg_rden * (float(num_verb_classes) - sum_tv)      # [T, 1]

    tobj = tgt_obj_boxes.astype(f32)
    obj_any = jnp.any(tobj != 0.0, axis=1, keepdims=True).astype(f32)
    tgt_small = pad_t(jnp.concatenate(
        [tgt_sub_boxes.astype(f32), tobj, row_const, neg_rden, obj_any,
         1.0 - obj_any, jnp.zeros((t, 4), f32)], axis=1))          # [T_pad, 16]

    # Predictions keep their natural [N, C] layout / native dtype.  Only the
    # tiny box tensors are packed/transposed into one lane-major [8, N] slab.
    boxes_packed = jnp.concatenate(
        [sub_boxes.astype(f32).T, obj_boxes.astype(f32).T], axis=0)  # [8, N]

    kern = functools.partial(_cost_kernel, w_obj=float(w_obj),
                             w_verb=float(w_verb), w_bbox=float(w_bbox),
                             w_iou=float(w_iou), ones_row=ones_row)

    # Raise the scoped-VMEM limit only when the per-step footprint gets big
    # (v5e default is 16 MiB; default tile sizes stay well under it).
    bytes_per_el = jnp.dtype(obj_logits.dtype).itemsize
    per_step = ((num_obj_classes + num_verb_classes) * tn * bytes_per_el
                + 8 * tn * 4 + 2 * t_pad * tn * 4)
    vmem_limit = None
    if 3 * per_step > 12 * 1024 * 1024:
        vmem_limit = int(min(3 * per_step + (4 << 20), 48 * 1024 * 1024))

    c_t = pl.pallas_call(
        kern,
        out_shape=jax.ShapeDtypeStruct((t_pad, n), f32),
        grid=(grid,),
        in_specs=[
            pl.BlockSpec((tn, num_obj_classes), lambda i: (i, 0)),   # [N, Co]
            pl.BlockSpec((tn, num_verb_classes), lambda i: (i, 0)),  # [N, Cv]
            pl.BlockSpec((8, tn), lambda i: (0, i)),                 # boxes^T
            pl.BlockSpec((t_pad, num_obj_classes), lambda i: (0, 0)),
            pl.BlockSpec((t_pad, num_verb_classes), lambda i: (0, 0)),
            pl.BlockSpec((t_pad, 16), lambda i: (0, 0)),
        ],
        out_specs=pl.BlockSpec((t_pad, tn), lambda i: (0, i)),
        compiler_params=pltpu.CompilerParams(
            dimension_semantics=("parallel",),
            vmem_limit_bytes=vmem_limit),
    )(obj_logits, verb_logits, boxes_packed, tgt_onehot, verb_lhs, tgt_small)

    # back to [N, T]; padded target rows stripped (tiny, fused in the jit)
    return c_t[:t, :].T


# --------------------------------------------------------------------------
# Host-side glue: HungarianMatcherHOI.forward
# --------------------------------------------------------------------------
def _linear_sum_assignment(cost):
    # TODO(synk): the Hungarian assignment is a sequential, data-dependent
    # host algorithm with no clean Pallas equivalent; use scipy if present,
    # brute force only for tiny problems.
    if _scipy_lsa is not None:
        r, c = _scipy_lsa(cost)
        return np.asarray(r, dtype=np.int64), np.asarray(c, dtype=np.int64)
    q, t = cost.shape
    best, best_perm = None, None
    for perm in itertools.permutations(range(q), t):
        s = sum(cost[perm[j], j] for j in range(t))
        if best is None or s < best:
            best, best_perm = s, perm
    pairs = sorted(zip(best_perm, range(t)))
    rows = np.asarray([p[0] for p in pairs], dtype=np.int64)
    cols = np.asarray([p[1] for p in pairs], dtype=np.int64)
    return rows, cols


def hungarian_matcher_hoi(outputs, targets, *, cost_obj_class=1.0,
                          cost_verb_class=1.0, cost_bbox=1.0, cost_iou=1.0):
    bs, num_queries, _ = outputs['pred_obj_logits'].shape
    obj_logits = outputs['pred_obj_logits'].reshape(bs * num_queries, -1)
    verb_logits = outputs['pred_verb_logits'].reshape(bs * num_queries, -1)
    sub_boxes = outputs['pred_sub_boxes'].reshape(bs * num_queries, 4)
    obj_boxes = outputs['pred_obj_boxes'].reshape(bs * num_queries, 4)

    sizes = [int(v['obj_labels'].shape[0]) for v in targets]
    if sum(sizes) == 0:  # no targets anywhere: nothing to match
        empty = (np.zeros((0,), np.int64), np.zeros((0,), np.int64))
        return ([empty for _ in targets],
                jnp.zeros((bs, num_queries, 0), jnp.float32))

    tgt_obj_labels = jnp.concatenate([v['obj_labels'] for v in targets])
    tgt_verb_labels = jnp.concatenate([v['verb_labels'] for v in targets])
    tgt_sub_boxes = jnp.concatenate([v['sub_boxes'] for v in targets])
    tgt_obj_boxes = jnp.concatenate([v['obj_boxes'] for v in targets])

    C = pallas_cost_matrix(obj_logits, verb_logits, sub_boxes, obj_boxes,
                           tgt_obj_labels, tgt_verb_labels, tgt_sub_boxes,
                           tgt_obj_boxes, w_obj=cost_obj_class,
                           w_verb=cost_verb_class, w_bbox=cost_bbox,
                           w_iou=cost_iou)
    C = jax.block_until_ready(C).reshape(bs, num_queries, -1)

    C_np = np.asarray(C)
    splits = np.cumsum(sizes)[:-1]
    indices = []
    for i, c in enumerate(np.split(C_np, splits, axis=-1)):
        if c.shape[-1] == 0:
            indices.append((np.zeros((0,), np.int64),
                            np.zeros((0,), np.int64)))
        else:
            indices.append(_linear_sum_assignment(c[i]))
    return indices, C


# --------------------------------------------------------------------------
# Pure-JAX reference of the cost matrix (numerical sanity check).
# --------------------------------------------------------------------------
def _reference_cost(obj_logits, verb_logits, sub_boxes, obj_boxes,
                    tgt_obj_labels, tgt_verb, tgt_sub, tgt_obj):
    def to_xyxy(b):
        cx, cy, w, h = b[..., 0], b[..., 1], b[..., 2], b[..., 3]
        return jnp.stack([cx - .5 * w, cy - .5 * h, cx + .5 * w, cy + .5 * h], -1)

    def giou(b1, b2):
        a1 = (b1[:, 2] - b1[:, 0]) * (b1[:, 3] - b1[:, 1])
        a2 = (b2[:, 2] - b2[:, 0]) * (b2[:, 3] - b2[:, 1])
        lt = jnp.maximum(b1[:, None, :2], b2[None, :, :2])
        rb = jnp.minimum(b1[:, None, 2:], b2[None, :, 2:])
        wh = jnp.clip(rb - lt, 0)
        inter = wh[..., 0] * wh[..., 1]
        union = a1[:, None] + a2[None, :] - inter
        iou = inter / union
        elt = jnp.minimum(b1[:, None, :2], b2[None, :, :2])
        erb = jnp.maximum(b1[:, None, 2:], b2[None, :, 2:])
        ewh = jnp.clip(erb - elt, 0)
        enc = ewh[..., 0] * ewh[..., 1]
        return iou - (enc - union) / enc

    p_obj = jax.nn.sigmoid(obj_logits)
    p_verb = jax.nn.sigmoid(verb_logits)
    vt = tgt_verb.T
    cvc = -(p_verb @ vt / (vt.sum(0, keepdims=True) + 1e-4)
            + (1 - p_verb) @ (1 - vt) / ((1 - vt).sum(0, keepdims=True) + 1e-4)) / 2
    alpha, gamma = 0.25, 2.0
    neg = (1 - alpha) * p_obj ** gamma * -jnp.log(1 - p_obj + 1e-8)
    pos = alpha * (1 - p_obj) ** gamma * -jnp.log(p_obj + 1e-8)
    coc = pos[:, tgt_obj_labels] - neg[:, tgt_obj_labels]
    csb = jnp.abs(sub_boxes[:, None, :] - tgt_sub[None, :, :]).sum(-1)
    cob = jnp.abs(obj_boxes[:, None, :] - tgt_obj[None, :, :]).sum(-1) * \
        jnp.any(tgt_obj != 0, axis=1)[None, :]
    cbb = jnp.maximum(csb, cob)
    csi = -giou(to_xyxy(sub_boxes), to_xyxy(tgt_sub))
    coi = -giou(to_xyxy(obj_boxes), to_xyxy(tgt_obj)) + \
        csi * jnp.all(tgt_obj == 0, axis=1)[None, :]
    ciou = jnp.maximum(csi, coi)
    return coc + cvc + cbb + ciou


if __name__ == "__main__":
    key = jax.random.PRNGKey(0)
    B, Q, CO, CV = 2, 8, 12, 16          # batch, queries, obj classes, verb classes
    sizes = [2, 4]                        # targets per image, T = 6

    ks = jax.random.split(key, 12)
    outputs = {
        'pred_obj_logits': jax.random.normal(ks[0], (B, Q, CO), jnp.float32),
        'pred_verb_logits': jax.random.normal(ks[1], (B, Q, CV), jnp.float32),
        'pred_sub_boxes': jnp.concatenate(
            [jax.random.uniform(ks[2], (B, Q, 2), minval=0.2, maxval=0.8),
             jax.random.uniform(ks[3], (B, Q, 2), minval=0.1, maxval=0.4)], -1),
        'pred_obj_boxes': jnp.concatenate(
            [jax.random.uniform(ks[4], (B, Q, 2), minval=0.2, maxval=0.8),
             jax.random.uniform(ks[5], (B, Q, 2), minval=0.1, maxval=0.4)], -1),
    }
    targets = []
    for b, t in enumerate(sizes):
        kk = jax.random.split(ks[6 + b], 5)
        obj_b = jnp.concatenate(
            [jax.random.uniform(kk[2], (t, 2), minval=0.2, maxval=0.8),
             jax.random.uniform(kk[3], (t, 2), minval=0.1, maxval=0.4)], -1)
        if b == 1:  # exercise the "no-object (all-zero) box" path
            obj_b = obj_b.at[0].set(0.0)
        targets.append({
            'obj_labels': jax.random.randint(kk[0], (t,), 0, CO),
            'verb_labels': (jax.random.uniform(kk[1], (t, CV)) < 0.3
                            ).astype(jnp.float32),
            'sub_boxes': jnp.concatenate(
                [jax.random.uniform(kk[4], (t, 2), minval=0.2, maxval=0.8),
                 jax.random.uniform(kk[4], (t, 2), minval=0.1, maxval=0.4)], -1),
            'obj_boxes': obj_b,
        })

    indices, C = hungarian_matcher_hoi(outputs, targets)
    jax.block_until_ready(C)

    # sanity check against a pure-JAX reference of the cost matrix
    C_ref = _reference_cost(
        outputs['pred_obj_logits'].reshape(B * Q, CO),
        outputs['pred_verb_logits'].reshape(B * Q, CV),
        outputs['pred_sub_boxes'].reshape(B * Q, 4),
        outputs['pred_obj_boxes'].reshape(B * Q, 4),
        jnp.concatenate([v['obj_labels'] for v in targets]),
        jnp.concatenate([v['verb_labels'] for v in targets]),
        jnp.concatenate([v['sub_boxes'] for v in targets]),
        jnp.concatenate([v['obj_boxes'] for v in targets]),
    ).reshape(B, Q, -1)
    np.testing.assert_allclose(np.asarray(C), np.asarray(C_ref),
                               rtol=1e-4, atol=1e-4)
    assert all(len(i) == len(j) == s for (i, j), s in zip(indices, sizes))

    # second check: multi-step grid with a ragged last tile (N=200, tn=128)
    N2, T2 = 200, 5
    k2 = jax.random.split(jax.random.PRNGKey(1), 8)

    def rand_boxes(k, n):
        a, b2 = jax.random.split(k, 2)
        return jnp.concatenate(
            [jax.random.uniform(a, (n, 2), minval=0.2, maxval=0.8),
             jax.random.uniform(b2, (n, 2), minval=0.1, maxval=0.4)], -1)

    obj_l2 = jax.random.normal(k2[0], (N2, CO), jnp.float32)
    verb_l2 = jax.random.normal(k2[1], (N2, CV), jnp.float32)
    sub_b2 = rand_boxes(k2[2], N2)
    obj_b2 = rand_boxes(k2[3], N2)
    t_lab2 = jax.random.randint(k2[4], (T2,), 0, CO)
    t_verb2 = (jax.random.uniform(k2[5], (T2, CV)) < 0.3).astype(jnp.float32)
    t_sub2 = rand_boxes(k2[6], T2)
    t_obj2 = rand_boxes(k2[7], T2).at[0].set(0.0)

    C2 = pallas_cost_matrix(obj_l2, verb_l2, sub_b2, obj_b2,
                            t_lab2, t_verb2, t_sub2, t_obj2)
    C2_ref = _reference_cost(obj_l2, verb_l2, sub_b2, obj_b2,
                             t_lab2, t_verb2, t_sub2, t_obj2)
    np.testing.assert_allclose(np.asarray(jax.block_until_ready(C2)),
                               np.asarray(C2_ref), rtol=1e-4, atol=1e-4)

    print("KERNEL_OK")
</pallas_src>

<mosaic_0001>
module attributes {stable_mosaic.version = 11 : i64} {
  func.func @_cost_kernel(%arg0: i32, %arg1: memref<128x12xf32, #tpu.memory_space<vmem>>, %arg2: memref<128x16xf32, #tpu.memory_space<vmem>>, %arg3: memref<8x128xf32, #tpu.memory_space<vmem>>, %arg4: memref<8x12xf32, #tpu.memory_space<vmem>>, %arg5: memref<8x16xf32, #tpu.memory_space<vmem>>, %arg6: memref<8x16xf32, #tpu.memory_space<vmem>>, %arg7: memref<8x128xf32, #tpu.memory_space<vmem>>) attributes {dimension_semantics = [#tpu.dimension_semantics<parallel>], iteration_bounds = array<i64: 1>, scalar_prefetch = 0 : i64, scratch_operands = 0 : i64, tpu.core_type = #tpu.core_type<tc>, window_params = [{transform_indices = @transform_0, window_bounds = array<i64: 128, 12>}, {transform_indices = @transform_1, window_bounds = array<i64: 128, 16>}, {transform_indices = @transform_2, window_bounds = array<i64: 8, 128>}, {pipeline_mode = #tpu.pipeline_mode<synchronous>, transform_indices = @transform_3, window_bounds = array<i64: 8, 12>}, {pipeline_mode = #tpu.pipeline_mode<synchronous>, transform_indices = @transform_4, window_bounds = array<i64: 8, 16>}, {pipeline_mode = #tpu.pipeline_mode<synchronous>, transform_indices = @transform_5, window_bounds = array<i64: 8, 16>}, {transform_indices = @transform_6, window_bounds = array<i64: 8, 128>}]} {
    %c0 = arith.constant 0 : index
    %c0_0 = arith.constant 0 : index
    %0 = vector.load %arg4[%c0, %c0_0] : memref<8x12xf32, #tpu.memory_space<vmem>>, vector<8x12xf32>
    %c0_1 = arith.constant 0 : index
    %c0_2 = arith.constant 0 : index
    %1 = vector.load %arg1[%c0_1, %c0_2] : memref<128x12xf32, #tpu.memory_space<vmem>>, vector<128x12xf32>
    %cst = arith.constant dense<0.000000e+00> : vector<8x128xf32>
    %2 = tpu.matmul %0, %1, %cst {dimension_numbers = #tpu.dot_dimension_numbers<[1], [1], [0], [0], [0, 0, 1, 0], [], []>} : vector<8x12xf32>, vector<128x12xf32>, vector<8x128xf32> -> vector<8x128xf32>
    %3 = arith.negf %2 : vector<8x128xf32>
    %4 = math.exp %3 : vector<8x128xf32>
    %cst_3 = arith.constant 1.000000e+00 : f32
    %5 = vector.broadcast %cst_3 : f32 to vector<8x128xf32>
    %6 = arith.addf %5, %4 : vector<8x128xf32>
    %7 = arith.divf %5, %6 : vector<8x128xf32>
    %8 = arith.mulf %7, %7 : vector<8x128xf32>
    %cst_4 = arith.constant 7.500000e-01 : f32
    %9 = vector.broadcast %cst_4 : f32 to vector<8x128xf32>
    %10 = arith.mulf %9, %8 : vector<8x128xf32>
    %cst_5 = arith.constant 1.000000e+00 : f32
    %11 = vector.broadcast %cst_5 : f32 to vector<8x128xf32>
    %12 = arith.subf %11, %7 : vector<8x128xf32>
    %cst_6 = arith.constant 9.99999993E-9 : f32
    %13 = vector.broadcast %cst_6 : f32 to vector<8x128xf32>
    %14 = arith.addf %12, %13 : vector<8x128xf32>
    %15 = math.log %14 : vector<8x128xf32>
    %cst_7 = arith.constant 0.000000e+00 : f32
    %16 = vector.broadcast %cst_7 : f32 to vector<8x128xf32>
    %17 = arith.subf %16, %15 : vector<8x128xf32>
    %18 = arith.mulf %10, %17 : vector<8x128xf32>
    %cst_8 = arith.constant 1.000000e+00 : f32
    %19 = vector.broadcast %cst_8 : f32 to vector<8x128xf32>
    %20 = arith.subf %19, %7 : vector<8x128xf32>
    %cst_9 = arith.constant 1.000000e+00 : f32
    %21 = vector.broadcast %cst_9 : f32 to vector<8x128xf32>
    %22 = arith.subf %21, %7 : vector<8x128xf32>
    %23 = arith.mulf %20, %22 : vector<8x128xf32>
    %cst_10 = arith.constant 2.500000e-01 : f32
    %24 = vector.broadcast %cst_10 : f32 to vector<8x128xf32>
    %25 = arith.mulf %24, %23 : vector<8x128xf32>
    %cst_11 = arith.constant 9.99999993E-9 : f32
    %26 = vector.broadcast %cst_11 : f32 to vector<8x128xf32>
    %27 = arith.addf %7, %26 : vector<8x128xf32>
    %28 = math.log %27 : vector<8x128xf32>
    %cst_12 = arith.constant 0.000000e+00 : f32
    %29 = vector.broadcast %cst_12 : f32 to vector<8x128xf32>
    %30 = arith.subf %29, %28 : vector<8x128xf32>
    %31 = arith.mulf %25, %30 : vector<8x128xf32>
    %32 = arith.subf %31, %18 : vector<8x128xf32>
    %c0_13 = arith.constant 0 : index
    %c0_14 = arith.constant 0 : index
    %33 = vector.load %arg6[%c0_13, %c0_14] : memref<8x16xf32, #tpu.memory_space<vmem>>, vector<8x16xf32>
    %c0_15 = arith.constant 0 : index
    %c0_16 = arith.constant 0 : index
    %34 = vector.load %arg2[%c0_15, %c0_16] : memref<128x16xf32, #tpu.memory_space<vmem>>, vector<128x16xf32>
    %35 = arith.negf %34 : vector<128x16xf32>
    %36 = math.exp %35 : vector<128x16xf32>
    %cst_17 = arith.constant 1.000000e+00 : f32
    %37 = vector.broadcast %cst_17 : f32 to vector<128x16xf32>
    %38 = arith.addf %37, %36 : vector<128x16xf32>
    %39 = arith.divf %37, %38 : vector<128x16xf32>
    %c0_18 = arith.constant 0 : index
    %c0_19 = arith.constant 0 : index
    %40 = vector.load %arg5[%c0_18, %c0_19] : memref<8x16xf32, #tpu.memory_space<vmem>>, vector<8x16xf32>
    %cst_20 = arith.constant dense<0.000000e+00> : vector<8x128xf32>
    %41 = tpu.matmul %40, %39, %cst_20 {dimension_numbers = #tpu.dot_dimension_numbers<[1], [1], [0], [0], [0, 0, 1, 0], [], []>} : vector<8x16xf32>, vector<128x16xf32>, vector<8x128xf32> -> vector<8x128xf32>
    %42 = vector.extract_strided_slice %41 {offsets = [6, 0], sizes = [1, 128], strides = [1, 1]} : vector<8x128xf32> to vector<1x128xf32>
    %43 = vector.extract_strided_slice %33 {offsets = [0, 8], sizes = [8, 1], strides = [1, 1]} : vector<8x16xf32> to vector<8x1xf32>
    %44 = vector.extract_strided_slice %33 {offsets = [0, 9], sizes = [8, 1], strides = [1, 1]} : vector<8x16xf32> to vector<8x1xf32>
    %45 = vector.broadcast %43 : vector<8x1xf32> to vector<8x128xf32>
    %46 = arith.addf %41, %45 : vector<8x128xf32>
    %47 = vector.broadcast %44 : vector<8x1xf32> to vector<8x128xf32>
    %48 = vector.broadcast %42 : vector<1x128xf32> to vector<8x128xf32>
    %49 = arith.mulf %47, %48 : vector<8x128xf32>
    %50 = arith.subf %46, %49 : vector<8x128xf32>
    %cst_21 = arith.constant -5.000000e-01 : f32
    %51 = vector.broadcast %cst_21 : f32 to vector<8x128xf32>
    %52 = arith.mulf %51, %50 : vector<8x128xf32>
    %c0_22 = arith.constant 0 : index
    %c0_23 = arith.constant 0 : index
    %53 = vector.load %arg3[%c0_22, %c0_23] : memref<8x128xf32, #tpu.memory_space<vmem>>, vector<8x128xf32>
    %54 = vector.extract_strided_slice %53 {offsets = [0, 0], sizes = [4, 128], strides = [1, 1]} : vector<8x128xf32> to vector<4x128xf32>
    %55 = vector.extract_strided_slice %53 {offsets = [4, 0], sizes = [4, 128], strides = [1, 1]} : vector<8x128xf32> to vector<4x128xf32>
    %56 = vector.extract_strided_slice %33 {offsets = [0, 0], sizes = [8, 4], strides = [1, 1]} : vector<8x16xf32> to vector<8x4xf32>
    %57 = vector.extract_strided_slice %33 {offsets = [0, 4], sizes = [8, 4], strides = [1, 1]} : vector<8x16xf32> to vector<8x4xf32>
    %58 = vector.extract_strided_slice %33 {offsets = [0, 10], sizes = [8, 1], strides = [1, 1]} : vector<8x16xf32> to vector<8x1xf32>
    %59 = vector.extract_strided_slice %33 {offsets = [0, 11], sizes = [8, 1], strides = [1, 1]} : vector<8x16xf32> to vector<8x1xf32>
    %60 = vector.extract_strided_slice %56 {offsets = [0, 0], sizes = [8, 1], strides = [1, 1]} : vector<8x4xf32> to vector<8x1xf32>
    %61 = vector.extract_strided_slice %54 {offsets = [0, 0], sizes = [1, 128], strides = [1, 1]} : vector<4x128xf32> to vector<1x128xf32>
    %62 = vector.broadcast %60 : vector<8x1xf32> to vector<8x128xf32>
    %63 = vector.broadcast %61 : vector<1x128xf32> to vector<8x128xf32>
    %64 = arith.subf %62, %63 : vector<8x128xf32>
    %65 = math.absf %64 : vector<8x128xf32>
    %66 = vector.extract_strided_slice %56 {offsets = [0, 1], sizes = [8, 1], strides = [1, 1]} : vector<8x4xf32> to vector<8x1xf32>
    %67 = vector.extract_strided_slice %54 {offsets = [1, 0], sizes = [1, 128], strides = [1, 1]} : vector<4x128xf32> to vector<1x128xf32>
    %68 = vector.broadcast %66 : vector<8x1xf32> to vector<8x128xf32>
    %69 = vector.broadcast %67 : vector<1x128xf32> to vector<8x128xf32>
    %70 = arith.subf %68, %69 : vector<8x128xf32>
    %71 = math.absf %70 : vector<8x128xf32>
    %72 = arith.addf %65, %71 : vector<8x128xf32>
    %73 = vector.extract_strided_slice %56 {offsets = [0, 2], sizes = [8, 1], strides = [1, 1]} : vector<8x4xf32> to vector<8x1xf32>
    %74 = vector.extract_strided_slice %54 {offsets = [2, 0], sizes = [1, 128], strides = [1, 1]} : vector<4x128xf32> to vector<1x128xf32>
    %75 = vector.broadcast %73 : vector<8x1xf32> to vector<8x128xf32>
    %76 = vector.broadcast %74 : vector<1x128xf32> to vector<8x128xf32>
    %77 = arith.subf %75, %76 : vector<8x128xf32>
    %78 = math.absf %77 : vector<8x128xf32>
    %79 = arith.addf %72, %78 : vector<8x128xf32>
    %80 = vector.extract_strided_slice %56 {offsets = [0, 3], sizes = [8, 1], strides = [1, 1]} : vector<8x4xf32> to vector<8x1xf32>
    %81 = vector.extract_strided_slice %54 {offsets = [3, 0], sizes = [1, 128], strides = [1, 1]} : vector<4x128xf32> to vector<1x128xf32>
    %82 = vector.broadcast %80 : vector<8x1xf32> to vector<8x128xf32>
    %83 = vector.broadcast %81 : vector<1x128xf32> to vector<8x128xf32>
    %84 = arith.subf %82, %83 : vector<8x128xf32>
    %85 = math.absf %84 : vector<8x128xf32>
    %86 = arith.addf %79, %85 : vector<8x128xf32>
    %87 = vector.extract_strided_slice %57 {offsets = [0, 0], sizes = [8, 1], strides = [1, 1]} : vector<8x4xf32> to vector<8x1xf32>
    %88 = vector.extract_strided_slice %55 {offsets = [0, 0], sizes = [1, 128], strides = [1, 1]} : vector<4x128xf32> to vector<1x128xf32>
    %89 = vector.broadcast %87 : vector<8x1xf32> to vector<8x128xf32>
    %90 = vector.broadcast %88 : vector<1x128xf32> to vector<8x128xf32>
    %91 = arith.subf %89, %90 : vector<8x128xf32>
    %92 = math.absf %91 : vector<8x128xf32>
    %93 = vector.extract_strided_slice %57 {offsets = [0, 1], sizes = [8, 1], strides = [1, 1]} : vector<8x4xf32> to vector<8x1xf32>
    %94 = vector.extract_strided_slice %55 {offsets = [1, 0], sizes = [1, 128], strides = [1, 1]} : vector<4x128xf32> to vector<1x128xf32>
    %95 = vector.broadcast %93 : vector<8x1xf32> to vector<8x128xf32>
    %96 = vector.broadcast %94 : vector<1x128xf32> to vector<8x128xf32>
    %97 = arith.subf %95, %96 : vector<8x128xf32>
    %98 = math.absf %97 : vector<8x128xf32>
    %99 = arith.addf %92, %98 : vector<8x128xf32>
    %100 = vector.extract_strided_slice %57 {offsets = [0, 2], sizes = [8, 1], strides = [1, 1]} : vector<8x4xf32> to vector<8x1xf32>
    %101 = vector.extract_strided_slice %55 {offsets = [2, 0], sizes = [1, 128], strides = [1, 1]} : vector<4x128xf32> to vector<1x128xf32>
    %102 = vector.broadcast %100 : vector<8x1xf32> to vector<8x128xf32>
    %103 = vector.broadcast %101 : vector<1x128xf32> to vector<8x128xf32>
    %104 = arith.subf %102, %103 : vector<8x128xf32>
    %105 = math.absf %104 : vector<8x128xf32>
    %106 = arith.addf %99, %105 : vector<8x128xf32>
    %107 = vector.extract_strided_slice %57 {offsets = [0, 3], sizes = [8, 1], strides = [1, 1]} : vector<8x4xf32> to vector<8x1xf32>
    %108 = vector.extract_strided_slice %55 {offsets = [3, 0], sizes = [1, 128], strides = [1, 1]} : vector<4x128xf32> to vector<1x128xf32>
    %109 = vector.broadcast %107 : vector<8x1xf32> to vector<8x128xf32>
    %110 = vector.broadcast %108 : vector<1x128xf32> to vector<8x128xf32>
    %111 = arith.subf %109, %110 : vector<8x128xf32>
    %112 = math.absf %111 : vector<8x128xf32>
    %113 = arith.addf %106, %112 : vector<8x128xf32>
    %114 = vector.broadcast %58 : vector<8x1xf32> to vector<8x128xf32>
    %115 = arith.mulf %113, %114 : vector<8x128xf32>
    %116 = arith.maximumf %86, %115 : vector<8x128xf32>
    %117 = vector.extract_strided_slice %54 {offsets = [0, 0], sizes = [1, 128], strides = [1, 1]} : vector<4x128xf32> to vector<1x128xf32>
    %118 = vector.extract_strided_slice %54 {offsets = [2, 0], sizes = [1, 128], strides = [1, 1]} : vector<4x128xf32> to vector<1x128xf32>
    %cst_24 = arith.constant 5.000000e-01 : f32
    %119 = vector.broadcast %cst_24 : f32 to vector<1x128xf32>
    %120 = arith.mulf %119, %118 : vector<1x128xf32>
    %121 = arith.subf %117, %120 : vector<1x128xf32>
    %122 = vector.extract_strided_slice %54 {offsets = [1, 0], sizes = [1, 128], strides = [1, 1]} : vector<4x128xf32> to vector<1x128xf32>
    %123 = vector.extract_strided_slice %54 {offsets = [3, 0], sizes = [1, 128], strides = [1, 1]} : vector<4x128xf32> to vector<1x128xf32>
    %cst_25 = arith.constant 5.000000e-01 : f32
    %124 = vector.broadcast %cst_25 : f32 to vector<1x128xf32>
    %125 = arith.mulf %124, %123 : vector<1x128xf32>
    %126 = arith.subf %122, %125 : vector<1x128xf32>
    %127 = vector.extract_strided_slice %54 {offsets = [0, 0], sizes = [1, 128], strides = [1, 1]} : vector<4x128xf32> to vector<1x128xf32>
    %128 = vector.extract_strided_slice %54 {offsets = [2, 0], sizes = [1, 128], strides = [1, 1]} : vector<4x128xf32> to vector<1x128xf32>
    %cst_26 = arith.constant 5.000000e-01 : f32
    %129 = vector.broadcast %cst_26 : f32 to vector<1x128xf32>
    %130 = arith.mulf %129, %128 : vector<1x128xf32>
    %131 = arith.addf %127, %130 : vector<1x128xf32>
    %132 = vector.extract_strided_slice %54 {offsets = [1, 0], sizes = [1, 128], strides = [1, 1]} : vector<4x128xf32> to vector<1x128xf32>
    %133 = vector.extract_strided_slice %54 {offsets = [3, 0], sizes = [1, 128], strides = [1, 1]} : vector<4x128xf32> to vector<1x128xf32>
    %cst_27 = arith.constant 5.000000e-01 : f32
    %134 = vector.broadcast %cst_27 : f32 to vector<1x128xf32>
    %135 = arith.mulf %134, %133 : vector<1x128xf32>
    %136 = arith.addf %132, %135 : vector<1x128xf32>
    %137 = vector.extract_strided_slice %56 {offsets = [0, 0], sizes = [8, 1], strides = [1, 1]} : vector<8x4xf32> to vector<8x1xf32>
    %138 = vector.extract_strided_slice %56 {offsets = [0, 2], sizes = [8, 1], strides = [1, 1]} : vector<8x4xf32> to vector<8x1xf32>
    %cst_28 = arith.constant 5.000000e-01 : f32
    %139 = vector.broadcast %cst_28 : f32 to vector<8x1xf32>
    %140 = arith.mulf %139, %138 : vector<8x1xf32>
    %141 = arith.subf %137, %140 : vector<8x1xf32>
    %142 = vector.extract_strided_slice %56 {offsets = [0, 1], sizes = [8, 1], strides = [1, 1]} : vector<8x4xf32> to vector<8x1xf32>
    %143 = vector.extract_strided_slice %56 {offsets = [0, 3], sizes = [8, 1], strides = [1, 1]} : vector<8x4xf32> to vector<8x1xf32>
    %cst_29 = arith.constant 5.000000e-01 : f32
    %144 = vector.broadcast %cst_29 : f32 to vector<8x1xf32>
    %145 = arith.mulf %144, %143 : vector<8x1xf32>
    %146 = arith.subf %142, %145 : vector<8x1xf32>
    %147 = vector.extract_strided_slice %56 {offsets = [0, 0], sizes = [8, 1], strides = [1, 1]} : vector<8x4xf32> to vector<8x1xf32>
    %148 = vector.extract_strided_slice %56 {offsets = [0, 2], sizes = [8, 1], strides = [1, 1]} : vector<8x4xf32> to vector<8x1xf32>
    %cst_30 = arith.constant 5.000000e-01 : f32
    %149 = vector.broadcast %cst_30 : f32 to vector<8x1xf32>
    %150 = arith.mulf %149, %148 : vector<8x1xf32>
    %151 = arith.addf %147, %150 : vector<8x1xf32>
    %152 = vector.extract_strided_slice %56 {offsets = [0, 1], sizes = [8, 1], strides = [1, 1]} : vector<8x4xf32> to vector<8x1xf32>
    %153 = vector.extract_strided_slice %56 {offsets = [0, 3], sizes = [8, 1], strides = [1, 1]} : vector<8x4xf32> to vector<8x1xf32>
    %cst_31 = arith.constant 5.000000e-01 : f32
    %154 = vector.broadcast %cst_31 : f32 to vector<8x1xf32>
    %155 = arith.mulf %154, %153 : vector<8x1xf32>
    %156 = arith.addf %152, %155 : vector<8x1xf32>
    %157 = arith.subf %131, %121 : vector<1x128xf32>
    %158 = arith.subf %136, %126 : vector<1x128xf32>
    %159 = arith.mulf %157, %158 : vector<1x128xf32>
    %160 = arith.subf %151, %141 : vector<8x1xf32>
    %161 = arith.subf %156, %146 : vector<8x1xf32>
    %162 = arith.mulf %160, %161 : vector<8x1xf32>
    %163 = vector.broadcast %131 : vector<1x128xf32> to vector<8x128xf32>
    %164 = vector.broadcast %151 : vector<8x1xf32> to vector<8x128xf32>
    %165 = arith.minimumf %163, %164 : vector<8x128xf32>
    %166 = vector.broadcast %121 : vector<1x128xf32> to vector<8x128xf32>
    %167 = vector.broadcast %141 : vector<8x1xf32> to vector<8x128xf32>
    %168 = arith.maximumf %166, %167 : vector<8x128xf32>
    %169 = arith.subf %165, %168 : vector<8x128xf32>
    %cst_32 = arith.constant 0.000000e+00 : f32
    %170 = vector.broadcast %cst_32 : f32 to vector<8x128xf32>
    %171 = arith.maximumf %169, %170 : vector<8x128xf32>
    %172 = vector.broadcast %136 : vector<1x128xf32> to vector<8x128xf32>
    %173 = vector.broadcast %156 : vector<8x1xf32> to vector<8x128xf32>
    %174 = arith.minimumf %172, %173 : vector<8x128xf32>
    %175 = vector.broadcast %126 : vector<1x128xf32> to vector<8x128xf32>
    %176 = vector.broadcast %146 : vector<8x1xf32> to vector<8x128xf32>
    %177 = arith.maximumf %175, %176 : vector<8x128xf32>
    %178 = arith.subf %174, %177 : vector<8x128xf32>
    %cst_33 = arith.constant 0.000000e+00 : f32
    %179 = vector.broadcast %cst_33 : f32 to vector<8x128xf32>
    %180 = arith.maximumf %178, %179 : vector<8x128xf32>
    %181 = arith.mulf %171, %180 : vector<8x128xf32>
    %182 = vector.broadcast %159 : vector<1x128xf32> to vector<8x128xf32>
    %183 = vector.broadcast %162 : vector<8x1xf32> to vector<8x128xf32>
    %184 = arith.addf %182, %183 : vector<8x128xf32>
    %185 = arith.subf %184, %181 : vector<8x128xf32>
    %186 = vector.broadcast %131 : vector<1x128xf32> to vector<8x128xf32>
    %187 = vector.broadcast %151 : vector<8x1xf32> to vector<8x128xf32>
    %188 = arith.maximumf %186, %187 : vector<8x128xf32>
    %189 = vector.broadcast %121 : vector<1x128xf32> to vector<8x128xf32>
    %190 = vector.broadcast %141 : vector<8x1xf32> to vector<8x128xf32>
    %191 = arith.minimumf %189, %190 : vector<8x128xf32>
    %192 = arith.subf %188, %191 : vector<8x128xf32>
    %cst_34 = arith.constant 0.000000e+00 : f32
    %193 = vector.broadcast %cst_34 : f32 to vector<8x128xf32>
    %194 = arith.maximumf %192, %193 : vector<8x128xf32>
    %195 = vector.broadcast %136 : vector<1x128xf32> to vector<8x128xf32>
    %196 = vector.broadcast %156 : vector<8x1xf32> to vector<8x128xf32>
    %197 = arith.maximumf %195, %196 : vector<8x128xf32>
    %198 = vector.broadcast %126 : vector<1x128xf32> to vector<8x128xf32>
    %199 = vector.broadcast %146 : vector<8x1xf32> to vector<8x128xf32>
    %200 = arith.minimumf %198, %199 : vector<8x128xf32>
    %201 = arith.subf %197, %200 : vector<8x128xf32>
    %cst_35 = arith.constant 0.000000e+00 : f32
    %202 = vector.broadcast %cst_35 : f32 to vector<8x128xf32>
    %203 = arith.maximumf %201, %202 : vector<8x128xf32>
    %204 = arith.mulf %194, %203 : vector<8x128xf32>
    %cst_36 = arith.constant 0.000000e+00 : f32
    %205 = vector.broadcast %cst_36 : f32 to vector<8x128xf32>
    %206 = arith.cmpf oeq, %185, %205 : vector<8x128xf32>
    %cst_37 = arith.constant 1.000000e+00 : f32
    %207 = vector.broadcast %cst_37 : f32 to vector<8x128xf32>
    %208 = arith.select %206, %207, %185 : vector<8x128xi1>, vector<8x128xf32>
    %cst_38 = arith.constant 0.000000e+00 : f32
    %209 = vector.broadcast %cst_38 : f32 to vector<8x128xf32>
    %210 = arith.cmpf oeq, %204, %209 : vector<8x128xf32>
    %cst_39 = arith.constant 1.000000e+00 : f32
    %211 = vector.broadcast %cst_39 : f32 to vector<8x128xf32>
    %212 = arith.select %210, %211, %204 : vector<8x128xi1>, vector<8x128xf32>
    %213 = arith.divf %181, %208 : vector<8x128xf32>
    %214 = arith.subf %204, %185 : vector<8x128xf32>
    %215 = arith.divf %214, %212 : vector<8x128xf32>
    %216 = arith.subf %213, %215 : vector<8x128xf32>
    %cst_40 = arith.constant 0.000000e+00 : f32
    %217 = vector.broadcast %cst_40 : f32 to vector<8x128xf32>
    %218 = arith.subf %217, %216 : vector<8x128xf32>
    %219 = vector.extract_strided_slice %55 {offsets = [0, 0], sizes = [1, 128], strides = [1, 1]} : vector<4x128xf32> to vector<1x128xf32>
    %220 = vector.extract_strided_slice %55 {offsets = [2, 0], sizes = [1, 128], strides = [1, 1]} : vector<4x128xf32> to vector<1x128xf32>
    %cst_41 = arith.constant 5.000000e-01 : f32
    %221 = vector.broadcast %cst_41 : f32 to vector<1x128xf32>
    %222 = arith.mulf %221, %220 : vector<1x128xf32>
    %223 = arith.subf %219, %222 : vector<1x128xf32>
    %224 = vector.extract_strided_slice %55 {offsets = [1, 0], sizes = [1, 128], strides = [1, 1]} : vector<4x128xf32> to vector<1x128xf32>
    %225 = vector.extract_strided_slice %55 {offsets = [3, 0], sizes = [1, 128], strides = [1, 1]} : vector<4x128xf32> to vector<1x128xf32>
    %cst_42 = arith.constant 5.000000e-01 : f32
    %226 = vector.broadcast %cst_42 : f32 to vector<1x128xf32>
    %227 = arith.mulf %226, %225 : vector<1x128xf32>
    %228 = arith.subf %224, %227 : vector<1x128xf32>
    %229 = vector.extract_strided_slice %55 {offsets = [0, 0], sizes = [1, 128], strides = [1, 1]} : vector<4x128xf32> to vector<1x128xf32>
    %230 = vector.extract_strided_slice %55 {offsets = [2, 0], sizes = [1, 128], strides = [1, 1]} : vector<4x128xf32> to vector<1x128xf32>
    %cst_43 = arith.constant 5.000000e-01 : f32
    %231 = vector.broadcast %cst_43 : f32 to vector<1x128xf32>
    %232 = arith.mulf %231, %230 : vector<1x128xf32>
    %233 = arith.addf %229, %232 : vector<1x128xf32>
    %234 = vector.extract_strided_slice %55 {offsets = [1, 0], sizes = [1, 128], strides = [1, 1]} : vector<4x128xf32> to vector<1x128xf32>
    %235 = vector.extract_strided_slice %55 {offsets = [3, 0], sizes = [1, 128], strides = [1, 1]} : vector<4x128xf32> to vector<1x128xf32>
    %cst_44 = arith.constant 5.000000e-01 : f32
    %236 = vector.broadcast %cst_44 : f32 to vector<1x128xf32>
    %237 = arith.mulf %236, %235 : vector<1x128xf32>
    %238 = arith.addf %234, %237 : vector<1x128xf32>
    %239 = vector.extract_strided_slice %57 {offsets = [0, 0], sizes = [8, 1], strides = [1, 1]} : vector<8x4xf32> to vector<8x1xf32>
    %240 = vector.extract_strided_slice %57 {offsets = [0, 2], sizes = [8, 1], strides = [1, 1]} : vector<8x4xf32> to vector<8x1xf32>
    %cst_45 = arith.constant 5.000000e-01 : f32
    %241 = vector.broadcast %cst_45 : f32 to vector<8x1xf32>
    %242 = arith.mulf %241, %240 : vector<8x1xf32>
    %243 = arith.subf %239, %242 : vector<8x1xf32>
    %244 = vector.extract_strided_slice %57 {offsets = [0, 1], sizes = [8, 1], strides = [1, 1]} : vector<8x4xf32> to vector<8x1xf32>
    %245 = vector.extract_strided_slice %57 {offsets = [0, 3], sizes = [8, 1], strides = [1, 1]} : vector<8x4xf32> to vector<8x1xf32>
    %cst_46 = arith.constant 5.000000e-01 : f32
    %246 = vector.broadcast %cst_46 : f32 to vector<8x1xf32>
    %247 = arith.mulf %246, %245 : vector<8x1xf32>
    %248 = arith.subf %244, %247 : vector<8x1xf32>
    %249 = vector.extract_strided_slice %57 {offsets = [0, 0], sizes = [8, 1], strides = [1, 1]} : vector<8x4xf32> to vector<8x1xf32>
    %250 = vector.extract_strided_slice %57 {offsets = [0, 2], sizes = [8, 1], strides = [1, 1]} : vector<8x4xf32> to vector<8x1xf32>
    %cst_47 = arith.constant 5.000000e-01 : f32
    %251 = vector.broadcast %cst_47 : f32 to vector<8x1xf32>
    %252 = arith.mulf %251, %250 : vector<8x1xf32>
    %253 = arith.addf %249, %252 : vector<8x1xf32>
    %254 = vector.extract_strided_slice %57 {offsets = [0, 1], sizes = [8, 1], strides = [1, 1]} : vector<8x4xf32> to vector<8x1xf32>
    %255 = vector.extract_strided_slice %57 {offsets = [0, 3], sizes = [8, 1], strides = [1, 1]} : vector<8x4xf32> to vector<8x1xf32>
    %cst_48 = arith.constant 5.000000e-01 : f32
    %256 = vector.broadcast %cst_48 : f32 to vector<8x1xf32>
    %257 = arith.mulf %256, %255 : vector<8x1xf32>
    %258 = arith.addf %254, %257 : vector<8x1xf32>
    %259 = arith.subf %233, %223 : vector<1x128xf32>
    %260 = arith.subf %238, %228 : vector<1x128xf32>
    %261 = arith.mulf %259, %260 : vector<1x128xf32>
    %262 = arith.subf %253, %243 : vector<8x1xf32>
    %263 = arith.subf %258, %248 : vector<8x1xf32>
    %264 = arith.mulf %262, %263 : vector<8x1xf32>
    %265 = vector.broadcast %233 : vector<1x128xf32> to vector<8x128xf32>
    %266 = vector.broadcast %253 : vector<8x1xf32> to vector<8x128xf32>
    %267 = arith.minimumf %265, %266 : vector<8x128xf32>
    %268 = vector.broadcast %223 : vector<1x128xf32> to vector<8x128xf32>
    %269 = vector.broadcast %243 : vector<8x1xf32> to vector<8x128xf32>
    %270 = arith.maximumf %268, %269 : vector<8x128xf32>
    %271 = arith.subf %267, %270 : vector<8x128xf32>
    %cst_49 = arith.constant 0.000000e+00 : f32
    %272 = vector.broadcast %cst_49 : f32 to vector<8x128xf32>
    %273 = arith.maximumf %271, %272 : vector<8x128xf32>
    %274 = vector.broadcast %238 : vector<1x128xf32> to vector<8x128xf32>
    %275 = vector.broadcast %258 : vector<8x1xf32> to vector<8x128xf32>
    %276 = arith.minimumf %274, %275 : vector<8x128xf32>
    %277 = vector.broadcast %228 : vector<1x128xf32> to vector<8x128xf32>
    %278 = vector.broadcast %248 : vector<8x1xf32> to vector<8x128xf32>
    %279 = arith.maximumf %277, %278 : vector<8x128xf32>
    %280 = arith.subf %276, %279 : vector<8x128xf32>
    %cst_50 = arith.constant 0.000000e+00 : f32
    %281 = vector.broadcast %cst_50 : f32 to vector<8x128xf32>
    %282 = arith.maximumf %280, %281 : vector<8x128xf32>
    %283 = arith.mulf %273, %282 : vector<8x128xf32>
    %284 = vector.broadcast %261 : vector<1x128xf32> to vector<8x128xf32>
    %285 = vector.broadcast %264 : vector<8x1xf32> to vector<8x128xf32>
    %286 = arith.addf %284, %285 : vector<8x128xf32>
    %287 = arith.subf %286, %283 : vector<8x128xf32>
    %288 = vector.broadcast %233 : vector<1x128xf32> to vector<8x128xf32>
    %289 = vector.broadcast %253 : vector<8x1xf32> to vector<8x128xf32>
    %290 = arith.maximumf %288, %289 : vector<8x128xf32>
    %291 = vector.broadcast %223 : vector<1x128xf32> to vector<8x128xf32>
    %292 = vector.broadcast %243 : vector<8x1xf32> to vector<8x128xf32>
    %293 = arith.minimumf %291, %292 : vector<8x128xf32>
    %294 = arith.subf %290, %293 : vector<8x128xf32>
    %cst_51 = arith.constant 0.000000e+00 : f32
    %295 = vector.broadcast %cst_51 : f32 to vector<8x128xf32>
    %296 = arith.maximumf %294, %295 : vector<8x128xf32>
    %297 = vector.broadcast %238 : vector<1x128xf32> to vector<8x128xf32>
    %298 = vector.broadcast %258 : vector<8x1xf32> to vector<8x128xf32>
    %299 = arith.maximumf %297, %298 : vector<8x128xf32>
    %300 = vector.broadcast %228 : vector<1x128xf32> to vector<8x128xf32>
    %301 = vector.broadcast %248 : vector<8x1xf32> to vector<8x128xf32>
    %302 = arith.minimumf %300, %301 : vector<8x128xf32>
    %303 = arith.subf %299, %302 : vector<8x128xf32>
    %cst_52 = arith.constant 0.000000e+00 : f32
    %304 = vector.broadcast %cst_52 : f32 to vector<8x128xf32>
    %305 = arith.maximumf %303, %304 : vector<8x128xf32>
    %306 = arith.mulf %296, %305 : vector<8x128xf32>
    %cst_53 = arith.constant 0.000000e+00 : f32
    %307 = vector.broadcast %cst_53 : f32 to vector<8x128xf32>
    %308 = arith.cmpf oeq, %287, %307 : vector<8x128xf32>
    %cst_54 = arith.constant 1.000000e+00 : f32
    %309 = vector.broadcast %cst_54 : f32 to vector<8x128xf32>
    %310 = arith.select %308, %309, %287 : vector<8x128xi1>, vector<8x128xf32>
    %cst_55 = arith.constant 0.000000e+00 : f32
    %311 = vector.broadcast %cst_55 : f32 to vector<8x128xf32>
    %312 = arith.cmpf oeq, %306, %311 : vector<8x128xf32>
    %cst_56 = arith.constant 1.000000e+00 : f32
    %313 = vector.broadcast %cst_56 : f32 to vector<8x128xf32>
    %314 = arith.select %312, %313, %306 : vector<8x128xi1>, vector<8x128xf32>
    %315 = arith.divf %283, %310 : vector<8x128xf32>
    %316 = arith.subf %306, %287 : vector<8x128xf32>
    %317 = arith.divf %316, %314 : vector<8x128xf32>
    %318 = arith.subf %315, %317 : vector<8x128xf32>
    %cst_57 = arith.constant 0.000000e+00 : f32
    %319 = vector.broadcast %cst_57 : f32 to vector<8x128xf32>
    %320 = arith.subf %319, %318 : vector<8x128xf32>
    %321 = vector.broadcast %59 : vector<8x1xf32> to vector<8x128xf32>
    %322 = arith.mulf %218, %321 : vector<8x128xf32>
    %323 = arith.addf %320, %322 : vector<8x128xf32>
    %324 = arith.maximumf %218, %323 : vector<8x128xf32>
    %cst_58 = arith.constant 1.000000e+00 : f32
    %325 = vector.broadcast %cst_58 : f32 to vector<8x128xf32>
    %326 = arith.mulf %325, %32 : vector<8x128xf32>
    %cst_59 = arith.constant 1.000000e+00 : f32
    %327 = vector.broadcast %cst_59 : f32 to vector<8x128xf32>
    %328 = arith.mulf %327, %52 : vector<8x128xf32>
    %329 = arith.addf %326, %328 : vector<8x128xf32>
    %cst_60 = arith.constant 1.000000e+00 : f32
    %330 = vector.broadcast %cst_60 : f32 to vector<8x128xf32>
    %331 = arith.mulf %330, %116 : vector<8x128xf32>
    %332 = arith.addf %329, %331 : vector<8x128xf32>
    %cst_61 = arith.constant 1.000000e+00 : f32
    %333 = vector.broadcast %cst_61 : f32 to vector<8x128xf32>
    %334 = arith.mulf %333, %324 : vector<8x128xf32>
    %335 = arith.addf %332, %334 : vector<8x128xf32>
    %c0_62 = arith.constant 0 : index
    %c0_63 = arith.constant 0 : index
    %336 = vector.load %arg7[%c0_62, %c0_63] : memref<8x128xf32, #tpu.memory_space<vmem>>, vector<8x128xf32>
    tpu.vector_store %arg7[%c0_62, %c0_63], %335 {strides = array<i32>} : memref<8x128xf32, #tpu.memory_space<vmem>>, vector<8x128xf32>,
    return
  }
  func.func @transform_0(%arg0: i32) -> (i32, i32) {
    %c0_i32 = arith.constant 0 : i32
    %c0_i32_0 = arith.constant 0 : i32
    return %arg0, %c0_i32 : i32, i32
  }
  func.func @transform_1(%arg0: i32) -> (i32, i32) {
    %c0_i32 = arith.constant 0 : i32
    %c0_i32_0 = arith.constant 0 : i32
    return %arg0, %c0_i32 : i32, i32
  }
  func.func @transform_2(%arg0: i32) -> (i32, i32) {
    %c0_i32 = arith.constant 0 : i32
    %c0_i32_0 = arith.constant 0 : i32
    return %c0_i32, %arg0 : i32, i32
  }
  func.func @transform_3(%arg0: i32) -> (i32, i32) {
    %c0_i32 = arith.constant 0 : i32
    %c0_i32_0 = arith.constant 0 : i32
    %c0_i32_1 = arith.constant 0 : i32
    return %c0_i32, %c0_i32_0 : i32, i32
  }
  func.func @transform_4(%arg0: i32) -> (i32, i32) {
    %c0_i32 = arith.constant 0 : i32
    %c0_i32_0 = arith.constant 0 : i32
    %c0_i32_1 = arith.constant 0 : i32
    return %c0_i32, %c0_i32_0 : i32, i32
  }
  func.func @transform_5(%arg0: i32) -> (i32, i32) {
    %c0_i32 = arith.constant 0 : i32
    %c0_i32_0 = arith.constant 0 : i32
    %c0_i32_1 = arith.constant 0 : i32
    return %c0_i32, %c0_i32_0 : i32, i32
  }
  func.func @transform_6(%arg0: i32) -> (i32, i32) {
    %c0_i32 = arith.constant 0 : i32
    %c0_i32_0 = arith.constant 0 : i32
    return %c0_i32, %arg0 : i32, i32
  }
}

</mosaic_0001>

<bundles_post_ra>
// kernel: mul.12
= control target key start
LH: loop header
LB: loop body
LE: loop exit
PB: predicated region body
PF: predicated region fallthrough
CT: control target
= control target key end

     0   :  { %s34_s0 = inlined_call_operand.vmem [shape: f32[6,1], index: 0, kind: input, shape index: {}]   ;;  %s35_s1 = inlined_call_operand.vmem [shape: f32[6,1], index: 1, kind: input, shape index: {}]   ;;  %s36_s2 = inlined_call_operand.vmem [shape: f32[6,1], index: 2, kind: output, shape index: {}]  }
   0x1   :  { %v3_v0 = vld [vmem:[%s34_s0] sm:$0x3f] }
   0x2   :  { %v4_v1 = vld [vmem:[%s35_s1] sm:$0x3f] }
   0x3   :  { %v7_v2 = vmul.f32 %v4_v1, %v3_v0 }
   0x5   :  { %9 = vst [vmem:[%s36_s2] sm:$0xff] %v7_v2 }

// kernel: pallas_cost_matrix.1
= control target key start
LH: loop header
LB: loop body
LE: loop exit
PB: predicated region body
PF: predicated region fallthrough
CT: control target
= control target key end

     0   :  { %vm40_vm0 = vcmask 97280   ;;  %v1051_v1 = vmov 0.0|0.0   ;;  %v1052_v7 = vmov 0   ;;  %vm1053_vm2 = vmmov 0   ;;  %s1057_s14 = smov 127   ;;  %s1392_s5 = inlined_call_operand.vmem [shape: f32[8,16], index: 5, kind: input, shape index: {}]   ;;  %s1393_s0 = inlined_call_operand.vmem [shape: f32[16,12], index: 0, kind: input, shape index: {}]   ;;  %s1394_s1 = inlined_call_operand.vmem [shape: f32[16,16], index: 1, kind: input, shape index: {}]   ;;  %s1395_s3 = inlined_call_operand.vmem [shape: f32[8,12], index: 3, kind: input, shape index: {}]   ;;  %s1396_s4 = inlined_call_operand.vmem [shape: f32[8,16], index: 4, kind: input, shape index: {}]   ;;  %s1397_s2 = inlined_call_operand.vmem [shape: f32[8,16], index: 2, kind: input, shape index: {}]   ;;  %s1398_s6 = inlined_call_operand.vmem [shape: f32[8,16], index: 6, kind: output, shape index: {}]  }
   0x1   :  { %v1106_v0 = vld [vmem:[%s1392_s5] sm:$0xff]  ;;  %869 = vmatprep.subr.bf16.mxu0 %v1051_v1  ;;  %v25_v3 = vld [vmem:[%s1393_s0 + $0x8] sm:$0xff]  ;;  %901 = vmatprep.subr.bf16.mxu1 %v1051_v1  ;;  %vm1119_vm1 = vmpackc.low %vm40_vm0, %vm40_vm0  ;;  %v1054_v8 = vmov 0.0   ;;  %v1055_v9 = vmov 1   ;;  %s1056_s5 = smov 126   ;;  %vm298_vm3 = vcmask 130048  }
   0x2   :  { %v24_v2 = vld [vmem:[%s1393_s0] sm:$0xff]  ;;  %v536_v4 = vmul.f32 0.5, %v1106_v0  ;;  %950 = vset.pattern.permute.xlu1 %v1052_v7  ;;  %831 = vmatprep.mubr.msk.f32.mxu0 %vm1053_vm2, %v1054_v8  ;;  %v26_v10 = vld [vmem:[%s1393_s0 + $0x10] sm:$0xff]  ;;  %v27_v11 = vld [vmem:[%s1393_s0 + $0x18] sm:$0xff]  ;;  %v1059_v57 = vmov 5  }
   0x3   :  { %v870_v5 = vpack.c.bf16 %v25_v3, %v24_v2  ;;  %951 = vset.pattern.permute.xlu0 %v1055_v9  ;;  %866 = vmatprep.mubr.msk.f32.mxu1 %vm1053_vm2, %v1054_v8  ;;  %v185_v12 = vld [vmem:[%s1394_s1] sm:$0xff]  ;;  %v186_v13 = vld [vmem:[%s1394_s1 + $0x8] sm:$0xff]  ;;  %v874_v16 = vpack.c.bf16 %v27_v11, %v26_v10  ;;  %v187_v17 = vld [vmem:[%s1394_s1 + $0x10] sm:$0xff] }
   0x4   :  { %538 = vrot.lane.b32.xlu0 %v536_v4, %s1056_s5  ;;  %v732_v14 = vmul.f32 -1.442695, %v185_v12  ;;  %v733_v15 = vmul.f32 -1.442695, %v186_v13  ;;  %v188_v18 = vld [vmem:[%s1394_s1 + $0x18] sm:$0xff]  ;;  %v189_v21 = vld [vmem:[%s1394_s1 + $0x20] sm:$0xff]  ;;  %vm1196_vm4 = vmpackc.low %vm298_vm3, %vm298_vm3 }
   0x5   :  { %872 = vmatpush3.bf16.xpose.msk.msra.mxu0 %vm1119_vm1, %v870_v5  ;;  %v734_v19 = vmul.f32 -1.442695, %v187_v17  ;;  %v735_v20 = vmul.f32 -1.442695, %v188_v18  ;;  %v190_v22 = vld [vmem:[%s1394_s1 + $0x28] sm:$0xff]  ;;  %v28_v23 = vld [vmem:[%s1393_s0 + $0x20] sm:$0xff] }
   0x6   :  { %873 = vmatprep.subr.bf16.mxu0 %v1051_v1  ;;  %971 = vpow2.f32 %v732_v14  ;;  %v29_v24 = vld [vmem:[%s1393_s0 + $0x28] sm:$0xff]  ;;  %v736_v25 = vmul.f32 -1.442695, %v189_v21  ;;  %v737_v26 = vmul.f32 -1.442695, %v190_v22  ;;  %v191_v28 = vld [vmem:[%s1394_s1 + $0x30] sm:$0xff] }
   0x7   :  { %973 = vpow2.f32 %v733_v15  ;;  %v878_v27 = vpack.c.bf16 %v29_v24, %v28_v23  ;;  %v192_v29 = vld [vmem:[%s1394_s1 + $0x38] sm:$0xff]  ;;  %v738_v33 = vmul.f32 -1.442695, %v191_v28  ;;  %v30_v35 = vld [vmem:[%s1393_s0 + $0x30] sm:$0xff]  ;;  %v193_v43 = vld [vmem:[%s1394_s1 + $0x40] sm:$0xff] }
   0x8   :  { %975 = vpow2.f32 %v734_v19  ;;  %v31_v36 = vld [vmem:[%s1393_s0 + $0x38] sm:$0xff]  ;;  %v739_v38 = vmul.f32 -1.442695, %v192_v29  ;;  %v194_v44 = vld [vmem:[%s1394_s1 + $0x48] sm:$0xff]  ;;  %v740_v47 = vmul.f32 -1.442695, %v193_v43 }
   0x9   :  { %977 = vpow2.f32 %v735_v20  ;;  %v882_v42 = vpack.c.bf16 %v31_v36, %v30_v35  ;;  %v32_v48 = vld [vmem:[%s1393_s0 + $0x40] sm:$0xff]  ;;  %v33_v49 = vld [vmem:[%s1393_s0 + $0x48] sm:$0xff]  ;;  %v741_v50 = vmul.f32 -1.442695, %v194_v44  ;;  %v195_v55 = vld [vmem:[%s1394_s1 + $0x50] sm:$0xff] }
   0xa   :  { %979 = vpow2.f32 %v736_v25  ;;  %v886_v54 = vpack.c.bf16 %v33_v49, %v32_v48  ;;  %v196_v60 = vld [vmem:[%s1394_s1 + $0x58] sm:$0xff]  ;;  %v742_v62 = vmul.f32 -1.442695, %v195_v55  ;;  %v34_v3 = vld [vmem:[%s1393_s0 + $0x50] sm:$0xff]  ;;  %v197_v13 = vld [vmem:[%s1394_s1 + $0x60] sm:$0xff] }
   0xb   :  { %981 = vpow2.f32 %v737_v26  ;;  %v35_v4 = vld [vmem:[%s1393_s0 + $0x58] sm:$0xff]  ;;  %v743_v5 = vmul.f32 -1.442695, %v196_v60  ;;  %v744_v18 = vmul.f32 -1.442695, %v197_v13  ;;  %v36_v20 = vld [vmem:[%s1393_s0 + $0x60] sm:$0xff] }
   0xc   :  { %v890_v11 = vpack.c.bf16 %v35_v4, %v34_v3  ;;  %v37_v21 = vld [vmem:[%s1393_s0 + $0x68] sm:$0xff]  ;;  %v199_v28 = vld [vmem:[%s1394_s1 + $0x70] sm:$0xff]  ;;  %v39_v35 = vld [vmem:[%s1393_s0 + $0x78] sm:$0xff]  ;;  %v1064_v13 = vmov 10  }
   0xd   :  { %876 = vmatpush3.bf16.xpose.msk.msra.mxu0 %vm1119_vm1, %v874_v16  ;;  %v198_v16 = vld [vmem:[%s1394_s1 + $0x68] sm:$0xff]  ;;  %v894_v25 = vpack.c.bf16 %v37_v21, %v36_v20  ;;  %v746_v36 = vmul.f32 -1.442695, %v199_v28 }
   0xe   :  { %877 = vmatprep.subr.bf16.mxu0 %v1051_v1  ;;  %v745_v23 = vmul.f32 -1.442695, %v198_v16 }
  0x10   :  { %v972_v30 = vpop.eup %971 }
  0x11   :  { %v974_v31 = vpop.eup %973  ;;  %v249_v32 = vadd.f32 1.0, %v972_v30  ;;  %v200_v30 = vld [vmem:[%s1394_s1 + $0x78] sm:$0xff] }
  0x12   :  { %v976_v34 = vpop.eup %975  ;;  %v250_v37 = vadd.f32 1.0, %v974_v31 }
  0x13   :  { %v978_v39 = vpop.eup %977  ;;  %983 = vrcp.f32 %v249_v32  ;;  %v251_v40 = vadd.f32 1.0, %v976_v34  ;;  %v38_v34 = vld [vmem:[%s1393_s0 + $0x70] sm:$0xff] }
  0x14   :  { %985 = vrcp.f32 %v250_v37  ;;  %v252_v41 = vadd.f32 1.0, %v978_v39  ;;  %v980_v45 = vpop.eup %979  ;;  %v747_v37 = vmul.f32 -1.442695, %v200_v30  ;;  %v898_v39 = vpack.c.bf16 %v39_v35, %v38_v34 }
  0x15   :  { %880 = vmatpush3.bf16.xpose.msk.msra.mxu0 %vm1119_vm1, %v878_v27  ;;  %987 = vpow2.f32 %v738_v33  ;;  %v982_v46 = vpop.eup %981  ;;  %v253_v51 = vadd.f32 1.0, %v980_v45 }
  0x16   :  { %881 = vmatprep.subr.bf16.mxu0 %v1051_v1  ;;  %989 = vpow2.f32 %v739_v38  ;;  %v254_v52 = vadd.f32 1.0, %v982_v46 }
  0x17   :  { %991 = vrcp.f32 %v251_v40 }
  0x18   :  { %993 = vrcp.f32 %v252_v41 }
  0x19   :  { %995 = vpow2.f32 %v740_v47  ;;  %v23_v47 = vld [vmem:[%s1395_s3] sm:$0xff] }
  0x1a   :  { %997 = vpow2.f32 %v741_v50 }
  0x1b   :  { %999 = vrcp.f32 %v253_v51 }
  0x1c   :  { %1001 = vrcp.f32 %v254_v52 }
  0x1d   :  { %884 = vmatpush3.bf16.xpose.msk.msra.mxu0 %vm1119_vm1, %v882_v42  ;;  %v984_v53 = vpop.eup %983  ;;  %1003 = vpow2.f32 %v742_v62  ;;  %v297_v62 = vld [vmem:[%s1396_s4] sm:$0xff] }
  0x1e   :  { %885 = vmatprep.subr.bf16.mxu0 %v1051_v1  ;;  %v986_v56 = vpop.eup %985  ;;  %1005 = vpow2.f32 %v743_v5 }
  0x1f   :  { %v988_v58 = vpop.eup %987  ;;  %v902_v59 = vpack.c.bf16 %v986_v56, %v984_v53 }
  0x20   :  { %v990_v61 = vpop.eup %989  ;;  %v255_v8 = vadd.f32 1.0, %v988_v58 }
  0x21   :  { %v992_v63 = vpop.eup %991  ;;  %904 = vmatpush3.bf16.xpose.msk.msra.mxu1 %vm1196_vm4, %v902_v59  ;;  %v256_v10 = vadd.f32 1.0, %v990_v61 }
  0x22   :  { %v994_v2 = vpop.eup %993  ;;  %905 = vmatprep.subr.bf16.mxu1 %v1051_v1  ;;  %1007 = vrcp.f32 %v255_v8 }
  0x23   :  { %v906_v12 = vpack.c.bf16 %v994_v2, %v992_v63  ;;  %v996_v14 = vpop.eup %995  ;;  %1009 = vrcp.f32 %v256_v10  ;;  %v1060_v10 = vmov 6  }
  0x24   :  { %v998_v15 = vpop.eup %997  ;;  %v257_v22 = vadd.f32 1.0, %v996_v14  ;;  %1011 = vpow2.f32 %v744_v18  ;;  %v1066_v14 = vmov 11  }
  0x25   :  { %888 = vmatpush3.bf16.xpose.msk.msra.mxu0 %vm1119_vm1, %v886_v54  ;;  %v1000_v17 = vpop.eup %999  ;;  %v258_v24 = vadd.f32 1.0, %v998_v15  ;;  %v1067_v15 = vmov 3  }
  0x26   :  { %889 = vmatprep.subr.bf16.mxu0 %v1051_v1  ;;  %v1002_v19 = vpop.eup %1001  ;;  %1013 = vrcp.f32 %v257_v22 }
  0x27   :  { %v910_v26 = vpack.c.bf16 %v1002_v19, %v1000_v17  ;;  %v1004_v27 = vpop.eup %1003  ;;  %1015 = vpow2.f32 %v745_v23 }
  0x28   :  { %v1006_v29 = vpop.eup %1005  ;;  %1017 = vrcp.f32 %v258_v24  ;;  %v259_v32 = vadd.f32 1.0, %v1004_v27  ;;  %v1298_v24 = vld [vmem:[%s1397_s2] sm:$0xff] }
  0x29   :  { %908 = vmatpush3.bf16.xpose.msk.msra.mxu1 %vm1196_vm4, %v906_v12  ;;  %v260_v38 = vadd.f32 1.0, %v1006_v29  ;;  %v1062_v12 = vmov 8   ;;  %v430_v29 = vlaneseq }
  0x2a   :  { %909 = vmatprep.subr.bf16.mxu1 %v1051_v1  ;;  %1019 = vrcp.f32 %v259_v32 }
  0x2b   :  { %1021 = vpow2.f32 %v746_v36 }
  0x2c   :  { %v1008_v31 = vpop.eup %1007  ;;  %1023 = vpow2.f32 %v747_v37 }
  0x2d   :  { %892 = vmatpush3.bf16.xpose.msk.msra.mxu0 %vm1119_vm1, %v890_v11  ;;  %v1010_v33 = vpop.eup %1009  ;;  %1025 = vrcp.f32 %v260_v38  ;;  %v1061_v11 = vmov 2  }
  0x2e   :  { %893 = vmatprep.subr.bf16.mxu0 %v1051_v1  ;;  %v914_v40 = vpack.c.bf16 %v1010_v33, %v1008_v31  ;;  %v1012_v41 = vpop.eup %1011  ;;  %v1305_v33 = vshrl.u32 %v430_v29, 7 }
  0x2f   :  { %v261_v45 = vadd.f32 1.0, %v1012_v41 }
  0x30   :  { %v1014_v42 = vpop.eup %1013  ;;  %v1308_v35 = vsub.s32 1, %v1305_v33  ;;  %v1311_v36 = vsub.s32 5, %v1305_v33  ;;  %v1318_v41 = vsub.s32 4, %v1305_v33 }
  0x31   :  { %912 = vmatpush3.bf16.xpose.msk.msra.mxu1 %vm1196_vm4, %v910_v26  ;;  %v1016_v43 = vpop.eup %1015  ;;  %1027 = vrcp.f32 %v261_v45  ;;  %v530_v26 = vmul.f32 0.5, %v1298_v24 }
  0x32   :  { %913 = vmatprep.subr.bf16.mxu1 %v1051_v1  ;;  %v1018_v44 = vpop.eup %1017  ;;  %v262_v46 = vadd.f32 1.0, %v1016_v43 }
  0x33   :  { %v918_v48 = vpack.c.bf16 %v1018_v44, %v1014_v42  ;;  %v532_v28 = vrot.slane %v530_v26, 2 }
  0x34   :  { %v1020_v49 = vpop.eup %1019  ;;  %1029 = vrcp.f32 %v262_v46 }
  0x35   :  { %896 = vmatpush3.bf16.xpose.msk.msra.mxu0 %vm1119_vm1, %v894_v25  ;;  %v1022_v50 = vpop.eup %1021  ;;  %v535_v31 = vadd.f32 %v532_v28, %v1298_v24  ;;  %v534_v32 = vsub.f32 %v1298_v24, %v532_v28 }
  0x36   :  { %897 = vmatprep.subr.bf16.mxu0 %v1051_v1  ;;  %v1024_v6 = vpop.eup %1023  ;;  %v263_v52 = vadd.f32 1.0, %v1022_v50 }
  0x37   :  { %v1026_v51 = vpop.eup %1025  ;;  %v264_v53 = vadd.f32 1.0, %v1024_v6  ;;  %v543_v34 = vsub.f32 %v535_v31, %v534_v32  ;;  %v660_v42 = vrot.slane %v534_v32, %v1311_v36  ;;  %v579_v45 = vrot.slane %v535_v31, %v1308_v35 }
  0x38   :  { %v922_v54 = vpack.c.bf16 %v1026_v51, %v1020_v49  ;;  %1031 = vrcp.f32 %v263_v52  ;;  %v631_v46 = vrot.slane %v535_v31, %v1318_v41  ;;  %v640_v51 = vrot.slane %v534_v32, %v1318_v41 }
  0x39   :  { %916 = vmatpush3.bf16.xpose.msk.msra.mxu1 %vm1196_vm4, %v914_v40  ;;  %1033 = vrcp.f32 %v264_v53  ;;  %v588_v40 = vrot.slane %v534_v32, %v1308_v35  ;;  %v545_v43 = vrot.slane %v543_v34, 1 }
  0x3a   :  { %917 = vmatprep.subr.bf16.mxu1 %v1051_v1 }
  0x3b   :  { %v1028_v55 = vpop.eup %1027 }
  0x3d   :  { %900 = vmatpush3.bf16.xpose.msk.msra.mxu0 %vm1119_vm1, %v898_v39  ;;  %v1314_v39 = vsub.s32 0, %v1305_v33 }
  0x3e   :  { %v1030_v56 = vpop.eup %1029 }
  0x3f   :  { %v926_v58 = vpack.c.bf16 %v1030_v56, %v1028_v55  ;;  %v567_v44 = vrot.slane %v534_v32, %v1314_v39  ;;  %v557_v50 = vrot.slane %v535_v31, %v1314_v39  ;;  %v547_v55 = vmul.f32 %v545_v43, %v543_v34 }
  0x41   :  { %920 = vmatpush3.bf16.xpose.msk.msra.mxu1 %vm1196_vm4, %v918_v48 }
  0x42   :  { %921 = vmatprep.subr.bf16.mxu1 %v1051_v1  ;;  %v1032_v59 = vpop.eup %1031 }
  0x43   :  { %v1034_v60 = vpop.eup %1033 }
  0x44   :  { %832 = vmatmul.mubr.msk.f32.vlgmr.msra.gmra.mrb[0].mxu0 %vm40_vm0, %v23_v47  ;;  %v930_v61 = vpack.c.bf16 %v1034_v60, %v1032_v59  ;;  %v651_v47 = vrot.slane %v535_v31, %v1311_v36 }
  0x49   :  { %924 = vmatpush3.bf16.xpose.msk.msra.mxu1 %vm1196_vm4, %v922_v54 }
  0x4a   :  { %925 = vmatprep.subr.bf16.mxu1 %v1051_v1 }
  0x51   :  { %928 = vmatpush3.bf16.xpose.msk.msra.mxu1 %vm1196_vm4, %v926_v58 }
  0x52   :  { %929 = vmatprep.subr.bf16.mxu1 %v1051_v1  ;;  %v1058_v1 = vmov 4  }
  0x59   :  { %932 = vmatpush3.bf16.xpose.msk.msra.mxu1 %vm1196_vm4, %v930_v61 }
  0x60   :  { %867 = vmatmul.mubr.msk.f32.vlgmr.msra.gmra.mrb[0].mxu1 %vm298_vm3, %v297_v62 }
  0x76   :  { %v539_v63 = vpop.permute.xlu0 %538 }
  0x77   :  { %v541_v2 = vsub.f32 %v1106_v0, %v539_v63  ;;  %v542_v3 = vadd.f32 %v539_v63, %v1106_v0 }
  0x79   :  { %560 = vperm.xlu1 %950, %v542_v3   ;;  %v548_v4 = vsub.f32 %v542_v3, %v541_v2 }
  0x7b   :  { %550 = vrot.lane.b32.xlu0 %v548_v4, %s1057_s14 }
  0x7d   :  { %570 = vperm.xlu1 %950, %v541_v2  }
  0x7f   :  { %581 = vperm.xlu0 %951, %v542_v3  }
  0x81   :  { %952 = vset.pattern.permute.xlu1 %v1055_v9 }
  0x82   :  { %590 = vperm.xlu1 %952, %v541_v2  }
  0x83   :  { %954 = vset.pattern.permute.xlu0 %v1058_v1 }
  0x84   :  { %642 = vperm.xlu0 %954, %v541_v2  }
  0x86   :  { %953 = vset.pattern.permute.xlu1 %v1058_v1 }
  0x87   :  { %633 = vperm.xlu1 %953, %v542_v3  }
  0x88   :  { %957 = vset.pattern.permute.xlu0 %v1059_v57 }
  0x89   :  { %492 = vperm.xlu0 %957, %v1106_v0  }
  0x8b   :  { %955 = vset.pattern.permute.xlu1 %v1059_v57 }
  0x8c   :  { %653 = vperm.xlu1 %955, %v542_v3  }
  0x8d   :  { %959 = vset.pattern.permute.xlu0 %v1052_v7 }
  0x90   :  { %662 = vperm.xlu1 %955, %v541_v2  }
  0x94   :  { %956 = vset.pattern.permute.xlu1 %v1058_v1 }
  0x95   :  { %482 = vperm.xlu1 %956, %v1106_v0  }
  0x99   :  { %958 = vset.pattern.permute.xlu1 %v1052_v7  ;;  %v1063_v7 = vmov 7  }
  0x9a   :  { %439 = vperm.xlu1 %958, %v1106_v0  }
  0x9e   :  { %960 = vset.pattern.permute.xlu1 %v1058_v1 }
  0xed   :  { %v551_v5 = vpop.permute.xlu0 %550 }
  0xee   :  { %v553_v8 = vmul.f32 %v551_v5, %v548_v4 }
  0xf0   :  { %674 = vperm.xlu1 %960, %v553_v8   ;;  %603 = vperm.xlu0 %959, %v553_v8  }
  0xf4   :  { %961 = vset.pattern.permute.xlu1 %v1055_v9  ;;  %962 = vset.pattern.permute.xlu0 %v1060_v10  ;;  %v1065_v9 = vmov 9  }
  0xf5   :  { %449 = vperm.xlu1 %961, %v1106_v0   ;;  %503 = vperm.xlu0 %962, %v1106_v0  }
  0xf8   :  { %v561_v20 = vpop.permute.xlu1 %560 }
  0xf9   :  { %963 = vset.pattern.permute.xlu1 %v1061_v11  ;;  %965 = vset.pattern.permute.xlu0 %v1062_v12  ;;  %v563_v3 = vmin.f32 %v557_v50, %v561_v20  ;;  %v608_v5 = vmax.f32 %v557_v50, %v561_v20  ;;  %v600_v20 = vrot.slane %v547_v55, %v1314_v39 }
  0xfa   :  { %460 = vperm.xlu1 %963, %v1106_v0   ;;  %422 = vperm.xlu0 %965, %v1106_v0  }
  0xfc   :  { %v571_v22 = vpop.permute.xlu1 %570 }
  0xfd   :  { %v573_v56 = vmax.f32 %v567_v44, %v571_v22  ;;  %v609_v61 = vmin.f32 %v567_v44, %v571_v22 }
  0xfe   :  { %964 = vset.pattern.permute.xlu1 %v1063_v7  ;;  %968 = vset.pattern.permute.xlu0 %v1064_v13  ;;  %v582_v37 = vpop.permute.xlu0 %581 }
  0xff   :  { %514 = vperm.xlu1 %964, %v1106_v0   ;;  %525 = vperm.xlu0 %968, %v1106_v0   ;;  %v584_v58 = vmin.f32 %v579_v45, %v582_v37  ;;  %v612_v62 = vmax.f32 %v579_v45, %v582_v37  ;;  %v574_v7 = vsub.f32 %v563_v3, %v573_v56 }
 0x100   :  { %v455_v3 = vrot.slane %v1298_v24, %v1308_v35 }
 0x101   :  { %v591_v23 = vpop.permute.xlu1 %590 }
 0x102   :  { %v593_v6 = vmax.f32 %v588_v40, %v591_v23  ;;  %v613_v53 = vmin.f32 %v588_v40, %v591_v23  ;;  %v672_v23 = vrot.slane %v547_v55, %v1318_v41  ;;  %v498_v55 = vrot.slane %v1298_v24, %v1311_v36 }
 0x103   :  { %966 = vset.pattern.permute.xlu1 %v1065_v9  ;;  %970 = vset.pattern.permute.xlu0 %v1066_v14  ;;  %v643_v54 = vpop.permute.xlu0 %642 }
 0x104   :  { %427 = vperm.xlu1 %966, %v1106_v0   ;;  %v594_v4 = vsub.f32 %v584_v58, %v593_v6  ;;  %v645_v1 = vmax.f32 %v640_v51, %v643_v54  ;;  %v614_v8 = vsub.f32 %v612_v62, %v613_v53  ;;  %v432_v6 = vsub.s32 6, %v1305_v33 }
 0x105   :  { %v519_v58 = vsub.s32 7, %v1305_v33 }
 0x106   :  { %v1301_v27 = vpop.permute.xlu1 %633 }
 0x107   :  { %v636_v59 = vmin.f32 %v631_v46, %v1301_v27  ;;  %v679_v10 = vmax.f32 %v631_v46, %v1301_v27  ;;  %v575_v27 = vmax.f32 %v574_v7, 0.0 }
 0x108   :  { %967 = vset.pattern.permute.xlu1 %v1067_v15  ;;  %v680_v15 = vmin.f32 %v640_v51, %v643_v54  ;;  %v488_v54 = vrot.slane %v1298_v24, %v1318_v41 }
 0x109   :  { %471 = vperm.xlu1 %967, %v1106_v0   ;;  %v646_v13 = vsub.f32 %v636_v59, %v645_v1 }
 0x10a   :  { %v681_v26 = vsub.f32 %v679_v10, %v680_v15 }
 0x10b   :  { %v654_v30 = vpop.permute.xlu1 %653 }
 0x10c   :  { %v656_v60 = vmin.f32 %v651_v47, %v654_v30  ;;  %v683_v11 = vmax.f32 %v651_v47, %v654_v30 }
 0x10d   :  { %969 = vset.pattern.permute.xlu1 %v1066_v14  ;;  %v610_v14 = vsub.f32 %v608_v5, %v609_v61  ;;  %v465_v61 = vsub.s32 2, %v1305_v33  ;;  %v520_v5 = vrot.slane %v1298_v24, %v519_v58 }
 0x10e   :  { %700 = vperm.xlu1 %969, %v1106_v0  }
 0x10f   :  { %v663_v38 = vpop.permute.xlu1 %662  ;;  %v611_v28 = vmax.f32 %v610_v14, 0.0  ;;  %v476_v14 = vsub.s32 3, %v1305_v33 }
 0x110   :  { %v665_v52 = vmax.f32 %v660_v42, %v663_v38  ;;  %v684_v63 = vmin.f32 %v660_v42, %v663_v38  ;;  %v682_v42 = vmax.f32 %v681_v26, 0.0 }
 0x112   :  { %v666_v57 = vsub.f32 %v656_v60, %v665_v52  ;;  %v509_v60 = vrot.slane %v1298_v24, %v432_v6 }
 0x114   :  { %v1325_v48 = vpop.permute.xlu1 %482  ;;  %v667_v22 = vmax.f32 %v666_v57, 0.0 }
 0x115   :  { %v489_v1 = vsub.f32 %v1325_v48, %v488_v54 }
 0x117   :  { %v158_v16 = vpop.f32.mrb[0].mxu0  ;;  %v490_v48 = vand.u32 2147483647, %v489_v1 }
 0x118   :  { %v833_v17 = vpop.f32.mrb[1].mxu0  ;;  %v731_v21 = vmul.f32 -1.442695, %v158_v16  ;;  %v685_v16 = vsub.f32 %v683_v11, %v684_v63  ;;  %v466_v11 = vrot.slane %v1298_v24, %v465_v61 }
 0x119   :  { %v1334_v12 = vpop.permute.xlu1 %439  ;;  %v493_v17 = vpop.permute.xlu0 %492 }
 0x11a   :  { %1035 = vpow2.f32 %v731_v21  ;;  %v595_v21 = vmax.f32 %v594_v4, 0.0  ;;  %v686_v29 = vmax.f32 %v685_v16, 0.0  ;;  %v499_v57 = vsub.f32 %v493_v17, %v498_v55 }
 0x11c   :  { %v1341_v37 = vmul.f32 %v595_v21, %v575_v27  ;;  %v1351_v45 = vmul.f32 %v686_v29, %v682_v42  ;;  %v500_v16 = vand.u32 2147483647, %v499_v57 }
 0x11e   :  { %vm690_vm8 = vcmp.eq.f32.partialorder %v1351_v45, 0.0 }
 0x11f   :  { %v691_v59 = vsel %vm690_vm8, 1.0, %v1351_v45 }
 0x124   :  { %v1036_v25 = vpop.eup %1035 }
 0x125   :  { %v165_v0 = vadd.f32 1.0, %v1036_v25  ;;  %v615_v25 = vmax.f32 %v614_v8, 0.0  ;;  %v445_v8 = vrot.slane %v1298_v24, %v1314_v39 }
 0x127   :  { %1037 = vrcp.f32 %v165_v0  ;;  %v647_v0 = vmax.f32 %v646_v13, 0.0  ;;  %v1343_v40 = vmul.f32 %v615_v25, %v611_v28 }
 0x129   :  { %v1339_v32 = vmul.f32 %v667_v22, %v647_v0  ;;  %vm619_vm7 = vcmp.eq.f32.partialorder %v1343_v40, 0.0 }
 0x12a   :  { %v620_v52 = vsel %vm619_vm7, 1.0, %v1343_v40 }
 0x131   :  { %v1327_v49 = vpop.eup %1037 }
 0x132   :  { %v170_v2 = vsub.f32 1.0, %v1327_v49  ;;  %v178_v9 = vadd.f32 1e-08, %v1327_v49  ;;  %v168_v36 = vmul.f32 %v1327_v49, %v1327_v49 }
 0x133   :  { %v1293_v18 = vpop.f32.mrb[0].mxu1 }
 0x134   :  { %v868_v19 = vpop.f32.mrb[1].mxu1  ;;  %1039 = vlog2.f32 %v178_v9  ;;  %v176_v62 = vmul.f32 %v170_v2, %v170_v2  ;;  %v433_v13 = vrot.slane %v1293_v18, %v432_v6  ;;  %v169_v9 = vmul.f32 0.75, %v168_v36 }
 0x135   :  { %v171_v19 = vadd.f32 1e-08, %v170_v2 }
 0x136   :  { %v177_v7 = vmul.f32 0.25, %v176_v62 }
 0x137   :  { %1041 = vlog2.f32 %v171_v19 }
 0x13e   :  { %v1040_v51 = vpop.eup %1039 }
 0x13f   :  { %v180_v63 = vmul.f32 0.6931472, %v1040_v51 }
 0x141   :  { %v1042_v53 = vpop.eup %1041  ;;  %v181_v35 = vsub.f32 0.0, %v180_v63 }
 0x142   :  { %v173_v4 = vmul.f32 0.6931472, %v1042_v53 }
 0x143   :  { %v182_v0 = vmul.f32 %v181_v35, %v177_v7 }
 0x144   :  { %v174_v49 = vsub.f32 0.0, %v173_v4 }
 0x146   :  { %v175_v28 = vmul.f32 %v174_v49, %v169_v9 }
 0x148   :  { %v183_v51 = vsub.f32 %v182_v0, %v175_v28 }
 0x16f   :  { %v675_v30 = vpop.permute.xlu1 %674  ;;  %v604_v31 = vpop.permute.xlu0 %603 }
 0x170   :  { %v677_v34 = vadd.f32 %v675_v30, %v672_v23  ;;  %v606_v38 = vadd.f32 %v604_v31, %v600_v20  ;;  %v446_v20 = vsub.f32 %v1334_v12, %v445_v8 }
 0x172   :  { %v1346_v43 = vsub.f32 %v677_v34, %v1339_v32  ;;  %v1349_v44 = vsub.f32 %v606_v38, %v1341_v37  ;;  %v501_v34 = vadd.f32 %v500_v16, %v490_v48 }
 0x174   :  { %vm688_vm5 = vcmp.eq.f32.partialorder %v1346_v43, 0.0  ;;  %vm617_vm6 = vcmp.eq.f32.partialorder %v1349_v44, 0.0  ;;  %v450_v46 = vpop.permute.xlu1 %449  ;;  %v504_v41 = vpop.permute.xlu0 %503  ;;  %v623_v22 = vsub.f32 %v1343_v40, %v1349_v44  ;;  %v694_v33 = vsub.f32 %v1351_v45, %v1346_v43 }
 0x175   :  { %v618_v47 = vsel %vm617_vm6, 1.0, %v1349_v44  ;;  %v689_v50 = vsel %vm688_vm5, 1.0, %v1346_v43  ;;  %v510_v2 = vsub.f32 %v504_v41, %v509_v60  ;;  %v456_v17 = vsub.f32 %v450_v46, %v455_v3 }
 0x176   :  { %1043 = vrcp.f32 %v618_v47  ;;  %v477_v40 = vrot.slane %v1298_v24, %v476_v14  ;;  %v447_v47 = vand.u32 2147483647, %v446_v20 }
 0x177   :  { %1045 = vrcp.f32 %v689_v50  ;;  %v511_v25 = vand.u32 2147483647, %v510_v2 }
 0x178   :  { %1047 = vrcp.f32 %v620_v52 }
 0x179   :  { %v461_v56 = vpop.permute.xlu1 %460  ;;  %1049 = vrcp.f32 %v691_v59  ;;  %v423_v21 = vpop.permute.xlu0 %422  ;;  %v512_v50 = vadd.f32 %v511_v25, %v501_v34 }
 0x17a   :  { %v425_v39 = vadd.f32 %v423_v21, %v1293_v18  ;;  %v467_v26 = vsub.f32 %v461_v56, %v466_v11  ;;  %v457_v18 = vand.u32 2147483647, %v456_v17 }
 0x17c   :  { %v468_v6 = vand.u32 2147483647, %v467_v26 }
 0x17e   :  { %v515_v10 = vpop.permute.xlu1 %514  ;;  %v526_v58 = vpop.permute.xlu0 %525 }
 0x17f   :  { %v521_v19 = vsub.f32 %v515_v10, %v520_v5 }
 0x180   :  { %v1044_v15 = vpop.eup %1043 }
 0x181   :  { %v1046_v23 = vpop.eup %1045  ;;  %v622_v30 = vmul.f32 %v1044_v15, %v1341_v37  ;;  %v522_v38 = vand.u32 2147483647, %v521_v19  ;;  %v458_v37 = vadd.f32 %v457_v18, %v447_v47 }
 0x182   :  { %v1048_v31 = vpop.eup %1047  ;;  %v693_v42 = vmul.f32 %v1046_v23, %v1339_v32 }
 0x183   :  { %v428_v27 = vpop.permute.xlu1 %427  ;;  %v625_v44 = vmul.f32 %v1048_v31, %v623_v22  ;;  %v1050_v46 = vpop.eup %1049  ;;  %v523_v54 = vadd.f32 %v522_v38, %v512_v50  ;;  %v469_v24 = vadd.f32 %v468_v6, %v458_v37 }
 0x184   :  { %v434_v29 = vmul.f32 %v433_v13, %v428_v27  ;;  %v696_v53 = vmul.f32 %v1050_v46, %v694_v33 }
 0x185   :  { %v626_v52 = vsub.f32 %v622_v30, %v625_v44  ;;  %v528_v61 = vmul.f32 %v526_v58, %v523_v54 }
 0x186   :  { %v435_v12 = vsub.f32 %v425_v39, %v434_v29  ;;  %v697_v59 = vsub.f32 %v693_v42, %v696_v53 }
 0x187   :  { %v627_v32 = vsub.f32 0.0, %v626_v52 }
 0x188   :  { %v436_v43 = vmul.f32 -0.5, %v435_v12  ;;  %v472_v45 = vpop.permute.xlu1 %471  ;;  %v698_v3 = vsub.f32 0.0, %v697_v59 }
 0x189   :  { %v478_v55 = vsub.f32 %v472_v45, %v477_v40 }
 0x18a   :  { %v706_v56 = vadd.f32 %v436_v43, %v183_v51 }
 0x18b   :  { %v479_v60 = vand.u32 2147483647, %v478_v55 }
 0x18d   :  { %v480_v62 = vadd.f32 %v479_v60, %v469_v24  ;;  %v701_v63 = vpop.permute.xlu1 %700 }
 0x18e   :  { %v703_v41 = vmul.f32 %v701_v63, %v627_v32 }
 0x18f   :  { %v529_v36 = vmax.f32 %v480_v62, %v528_v61 }
 0x190   :  { %v704_v4 = vadd.f32 %v703_v41, %v698_v3 }
 0x191   :  { %v707_v1 = vadd.f32 %v706_v56, %v529_v36 }
 0x192   :  { %v705_v57 = vmax.f32 %v627_v32, %v704_v4 }
 0x194   :  { %v708_v5 = vadd.f32 %v707_v1, %v705_v57 }
 0x196   :  { %709 = vst [vmem:[%s1398_s6] sm:$0xff] %v708_v5 }

</bundles_post_ra>
